<compile_context>
chip_gen: v7x
topology: tpu7x:2x2x1
jax: 0.10.0
libtpu: 0.0.40
codegen_flags: <defaults>
</compile_context>

<pallas_src>
import functools

import jax
import jax.numpy as jnp
from jax import lax
from jax.experimental import pallas as pl
from jax.experimental.pallas import tpu as pltpu


def _tv_partials_kernel(x_ref, o_ref, *, H, W):
    """One (image, channel-block) tile per grid step.

    x_ref: (1, cb, H*W) block — flattened spatial on the lane axis.
    o_ref: (1, 1, 128) f32 partial sums — lane 0 = h_tv, lane 1 = w_tv.
    """
    hw = H * W
    x = x_ref[...].astype(jnp.float32)                 # (1, cb, HW)

    # Vertical (row-to-row) differences: in row-major flattened spatial layout
    # x[h+1, w] sits exactly W lanes after x[h, w]; every such pair is valid.
    d_h = x[:, :, W:] - x[:, :, : hw - W]              # (1, cb, (H-1)*W)
    h_tv = jnp.sum(d_h * d_h)

    # Horizontal (column-to-column) differences: adjacent lanes, but pairs whose
    # left element is in the last column straddle a row boundary -> mask them.
    d_w = x[:, :, 1:] - x[:, :, : hw - 1]              # (1, cb, HW-1)
    j = lax.broadcasted_iota(jnp.int32, d_w.shape, dimension=2)
    in_row = (j % W) != (W - 1)
    w_tv = jnp.sum(jnp.where(in_row, d_w * d_w, 0.0))

    # Fully-written lane-dense output block (no accumulator, no masked RMW).
    lane = lax.broadcasted_iota(jnp.int32, o_ref.shape, dimension=2)
    o_ref[...] = jnp.where(lane == 0, h_tv, jnp.where(lane == 1, w_tv, 0.0))


def _pick_channel_block(C, hw, itemsize, budget_bytes=2 << 20):
    """Largest channel block that (a) divides C, (b) keeps the (8,128) block
    rule happy (cb == C or cb % 8 == 0), and (c) fits the per-step budget."""
    candidates = [d for d in range(1, C + 1)
                  if C % d == 0 and (d == C or d % 8 == 0)]
    fitting = [d for d in candidates if d * hw * itemsize <= budget_bytes]
    # TODO(synk): for images where even the smallest legal channel block blows
    # the budget, additionally tile the flattened spatial axis with a W halo.
    return max(fitting) if fitting else min(candidates)


def tv_loss(x, tv_loss_weight=1.0):
    """TV loss over an NCHW batch; identical to the PyTorch TVLoss module."""
    assert x.ndim == 4, "expected NCHW input"
    N, C, H, W = x.shape
    hw = H * W

    # Free reshape (contiguous NCHW): put the whole spatial extent on lanes.
    x_flat = x.reshape(N, C, hw)

    cb = _pick_channel_block(C, hw, x.dtype.itemsize)
    num_cb = C // cb

    # Per-tile partials live on the lane axis of a single (N, 1, 128*num_cb)
    # slab so every output block is (1, 1, 128): lane-dense, unmasked stores.
    partials = pl.pallas_call(
        functools.partial(_tv_partials_kernel, H=H, W=W),
        out_shape=jax.ShapeDtypeStruct((N, 1, 128 * num_cb), jnp.float32),
        grid_spec=pl.GridSpec(
            grid=(N, num_cb),
            in_specs=[pl.BlockSpec((1, cb, hw), lambda n, c: (n, c, 0))],
            out_specs=pl.BlockSpec((1, 1, 128), lambda n, c: (n, 0, c)),
        ),
        compiler_params=pltpu.CompilerParams(
            dimension_semantics=("parallel", "parallel"),  # fully independent tiles
        ),
    )(x_flat)

    partials = partials.reshape(N, num_cb, 128)
    h_tv = jnp.sum(partials[..., 0])
    w_tv = jnp.sum(partials[..., 1])
    count_h = C * (H - 1) * W
    count_w = C * H * (W - 1)
    loss = tv_loss_weight * 2.0 * (h_tv / count_h + w_tv / count_w) / N
    return loss.astype(jnp.float32)


if __name__ == "__main__":
    key = jax.random.PRNGKey(0)
    N, C, H, W = 2, 4, 16, 16
    x = jax.random.normal(key, (N, C, H, W), dtype=jnp.float32)

    loss = jax.block_until_ready(tv_loss(x))

    # Pure-JAX reference of the exact PyTorch TVLoss semantics.
    count_h = C * (H - 1) * W
    count_w = C * H * (W - 1)
    h_tv = jnp.sum((x[:, :, 1:, :] - x[:, :, : H - 1, :]) ** 2)
    w_tv = jnp.sum((x[:, :, :, 1:] - x[:, :, :, : W - 1]) ** 2)
    ref = 1.0 * 2.0 * (h_tv / count_h + w_tv / count_w) / N

    assert jnp.allclose(loss, ref, rtol=1e-5, atol=1e-5), (loss, ref)
    print("KERNEL_OK")
</pallas_src>

<mosaic_0001>
module attributes {stable_mosaic.version = 11 : i64} {
  func.func @_tv_partials_kernel(%arg0: i32, %arg1: i32, %arg2: memref<1x4x256xf32, #tpu.memory_space<vmem>>, %arg3: memref<1x1x128xf32, #tpu.memory_space<vmem>>) attributes {dimension_semantics = [#tpu.dimension_semantics<parallel>, #tpu.dimension_semantics<parallel>], iteration_bounds = array<i64: 2, 1>, scalar_prefetch = 0 : i64, scratch_operands = 0 : i64, tpu.core_type = #tpu.core_type<tc>, window_params = [{transform_indices = @transform_0, window_bounds = array<i64: 1, 4, 256>}, {transform_indices = @transform_1, window_bounds = array<i64: 1, 1, 128>}]} {
    %c0 = arith.constant 0 : index
    %c0_0 = arith.constant 0 : index
    %c0_1 = arith.constant 0 : index
    %0 = vector.load %arg2[%c0, %c0_0, %c0_1] : memref<1x4x256xf32, #tpu.memory_space<vmem>>, vector<1x4x256xf32>
    %1 = vector.extract_strided_slice %0 {offsets = [0, 0, 16], sizes = [1, 4, 240], strides = [1, 1, 1]} : vector<1x4x256xf32> to vector<1x4x240xf32>
    %2 = vector.extract_strided_slice %0 {offsets = [0, 0, 0], sizes = [1, 4, 240], strides = [1, 1, 1]} : vector<1x4x256xf32> to vector<1x4x240xf32>
    %3 = arith.subf %1, %2 : vector<1x4x240xf32>
    %4 = arith.mulf %3, %3 : vector<1x4x240xf32>
    %5 = vector.shape_cast %4 : vector<1x4x240xf32> to vector<1x1x4x240xf32>
    %cst = arith.constant dense<0.000000e+00> : vector<1xf32>
    %6 = vector.multi_reduction <add>, %5, %cst [1, 2, 3] : vector<1x1x4x240xf32> to vector<1xf32>
    %7 = vector.shape_cast %6 : vector<1xf32> to vector<1x1x1x1xf32>
    %8 = vector.extract %7[0, 0, 0, 0] : f32 from vector<1x1x1x1xf32>
    %9 = vector.extract_strided_slice %0 {offsets = [0, 0, 1], sizes = [1, 4, 255], strides = [1, 1, 1]} : vector<1x4x256xf32> to vector<1x4x255xf32>
    %10 = vector.extract_strided_slice %0 {offsets = [0, 0, 0], sizes = [1, 4, 255], strides = [1, 1, 1]} : vector<1x4x256xf32> to vector<1x4x255xf32>
    %11 = arith.subf %9, %10 : vector<1x4x255xf32>
    %12 = tpu.iota {dimensions = array<i32: 2>} : vector<1x4x255xi32>
    %c16_i32 = arith.constant 16 : i32
    %c0_i32 = arith.constant 0 : i32
    %13 = arith.cmpi eq, %c16_i32, %c0_i32 : i32
    %c1_i32 = arith.constant 1 : i32
    %14 = arith.select %13, %c1_i32, %c16_i32 : i32
    %15 = vector.broadcast %14 : i32 to vector<1x4x255xi32>
    %16 = arith.remsi %12, %15 : vector<1x4x255xi32>
    %c0_i32_2 = arith.constant 0 : i32
    %17 = vector.broadcast %c0_i32_2 : i32 to vector<1x4x255xi32>
    %18 = arith.cmpi ne, %16, %17 : vector<1x4x255xi32>
    %c0_i32_3 = arith.constant 0 : i32
    %19 = vector.broadcast %c0_i32_3 : i32 to vector<1x4x255xi32>
    %20 = arith.cmpi slt, %16, %19 : vector<1x4x255xi32>
    %c0_i32_4 = arith.constant 0 : i32
    %21 = arith.cmpi slt, %14, %c0_i32_4 : i32
    %22 = vector.broadcast %21 : i1 to vector<1x4x255xi1>
    %23 = vector.broadcast %22 : vector<1x4x255xi1> to vector<1x4x255xi1>
    %24 = arith.xori %20, %23 : vector<1x4x255xi1>
    %25 = arith.andi %24, %18 : vector<1x4x255xi1>
    %26 = vector.broadcast %14 : i32 to vector<1x4x255xi32>
    %27 = arith.addi %16, %26 : vector<1x4x255xi32>
    %28 = arith.select %25, %27, %16 : vector<1x4x255xi1>, vector<1x4x255xi32>
    %c15_i32 = arith.constant 15 : i32
    %29 = vector.broadcast %c15_i32 : i32 to vector<1x4x255xi32>
    %30 = arith.cmpi ne, %28, %29 : vector<1x4x255xi32>
    %31 = arith.mulf %11, %11 : vector<1x4x255xf32>
    %cst_5 = arith.constant 0.000000e+00 : f32
    %32 = vector.broadcast %cst_5 : f32 to vector<1x4x255xf32>
    %33 = arith.select %30, %31, %32 : vector<1x4x255xi1>, vector<1x4x255xf32>
    %34 = vector.shape_cast %33 : vector<1x4x255xf32> to vector<1x1x4x255xf32>
    %cst_6 = arith.constant dense<0.000000e+00> : vector<1xf32>
    %35 = vector.multi_reduction <add>, %34, %cst_6 [1, 2, 3] : vector<1x1x4x255xf32> to vector<1xf32>
    %36 = vector.shape_cast %35 : vector<1xf32> to vector<1x1x1x1xf32>
    %37 = vector.extract %36[0, 0, 0, 0] : f32 from vector<1x1x1x1xf32>
    %38 = tpu.iota {dimensions = array<i32: 2>} : vector<1x1x128xi32>
    %c0_i32_7 = arith.constant 0 : i32
    %39 = vector.broadcast %c0_i32_7 : i32 to vector<1x1x128xi32>
    %40 = arith.cmpi eq, %38, %39 : vector<1x1x128xi32>
    %c1_i32_8 = arith.constant 1 : i32
    %41 = vector.broadcast %c1_i32_8 : i32 to vector<1x1x128xi32>
    %42 = arith.cmpi eq, %38, %41 : vector<1x1x128xi32>
    %cst_9 = arith.constant 0.000000e+00 : f32
    %43 = vector.broadcast %37 : f32 to vector<1x1x128xf32>
    %44 = vector.broadcast %cst_9 : f32 to vector<1x1x128xf32>
    %45 = arith.select %42, %43, %44 : vector<1x1x128xi1>, vector<1x1x128xf32>
    %46 = vector.broadcast %8 : f32 to vector<1x1x128xf32>
    %47 = arith.select %40, %46, %45 : vector<1x1x128xi1>, vector<1x1x128xf32>
    %c0_10 = arith.constant 0 : index
    %c0_11 = arith.constant 0 : index
    %c0_12 = arith.constant 0 : index
    %48 = vector.load %arg3[%c0_10, %c0_11, %c0_12] : memref<1x1x128xf32, #tpu.memory_space<vmem>>, vector<1x1x128xf32>
    tpu.vector_store %arg3[%c0_10, %c0_11, %c0_12], %47 {strides = array<i32>} : memref<1x1x128xf32, #tpu.memory_space<vmem>>, vector<1x1x128xf32>,
    return
  }
  func.func @transform_0(%arg0: i32, %arg1: i32) -> (i32, i32, i32) {
    %c0_i32 = arith.constant 0 : i32
    %c0_i32_0 = arith.constant 0 : i32
    return %arg0, %arg1, %c0_i32 : i32, i32, i32
  }
  func.func @transform_1(%arg0: i32, %arg1: i32) -> (i32, i32, i32) {
    %c0_i32 = arith.constant 0 : i32
    %c0_i32_0 = arith.constant 0 : i32
    return %arg0, %c0_i32, %arg1 : i32, i32, i32
  }
}

</mosaic_0001>

<bundles_post_ra>
// kernel: tpu_custom_call.1
= control target key start
LH: loop header
LB: loop body
LE: loop exit
PB: predicated region body
PF: predicated region fallthrough
CT: control target
= control target key end

     0   :  { %6 = vsyncpa [#allocation3], 0  ;;  %s731_s0 = inlined_call_operand.hbm [shape: f32[2,4,256], index: 0, kind: input, shape index: {}]   ;;  %s732_s1 = inlined_call_operand.hbm [shape: f32[2,1,128], index: 1, kind: output, shape index: {}]  }
   0x1   :  { %8 = vsyncpa [#allocation3 + $0x1], 0 }
   0x2   :  { %9 = vsyncpa [#allocation4], 0 }
   0x3   :  { %11 = vsyncpa [#allocation4 + $0x1], 0  ;;  %s558_s6 = smov 0   ;;  %s560_s7 = smov 0  }
   0x4   :  { %s562_s8 = smov 0   ;;  %s564_s9 = smov 0  }
   0x5   :  { %s566_s10 = smov 0   ;;  %s568_s11 = smov 0  }
   0x6 LB: > { %s345_s12 = sadd.s32 4294967295, %s540_s11   ;;  %s346_s13 = sadd.s32 4294967294, %s540_s11   ;;  %s540_s11 = sphi %s568_s11, %s17_s11   ;;  %s536_s10 = sphi %s566_s10, %s748_s10   ;;  %s532_s9 = sphi %s564_s9, %s747_s9   ;;  %s528_s8 = sphi %s562_s8, %s746_s8   ;;  %s524_s7 = sphi %s560_s7, %s745_s7   ;;  %s520_s6 = sphi %s558_s6, %s744_s6  }
   0x7   : > { %s29_s14 = sadd.s32 1, %s536_s10  ;;  %s38_s15 = sadd.s32 1, %s528_s8 }
   0x8   : > { %p31_p0 = scmp.ge.s32.totalorder %s29_s14, 2  ;;  %p45_p1 = scmp.ne.s32.totalorder %s528_s8, %s524_s7 }
   0x9   : > { %p46_p2 = scmp.eq.s32.totalorder %s540_s11, 0  ;;  %p51_p3 = scmp.ne.s32.totalorder %s524_s7, %s520_s6 }
   0xa   : > { %s750_s14 = smov (%p31_p0, %s29_s14), 0  ;;  %p52_p5 = scmp.eq.s32.totalorder %s345_s12, 0 }
   0xb   : > { %p599_p4 = por %p46_p2, %p45_p1  ;;  %s33_s17 = ssub.s32 %s536_s10, %s750_s14 }
   0xc   : > { %p77_p6 = scmp.eq.s32.totalorder %s345_s12, 1  ;;  %p36_p7 = scmp.eq.s32.totalorder %s33_s17, 0 }
   0xd   : > { %p605_p8 = por %p52_p5, %p51_p3  ;;  %p83_p10 = scmp.eq.s32.totalorder %s346_s13, 1 }
   0xe   : > { %p609_p9 = por %p77_p6, %p45_p1  ;;  %p374_p13 = scmp.lt.s32.totalorder %s540_s11, 2 }
   0xf   : > { %s614_s20 = scalar_select %p36_p7, %s528_s8, %s38_s15  }
  0x10   : > { %s736_s19 = scalar_select %p609_p9, 1, 0 }
  0x11   : > { %p616_p11 = por %p83_p10, %p51_p3  ;;  %s103_s22 = sand.u32 1, %s528_s8  }
  0x12   : > { %s349_s23 = sshll.u32 %s103_s22, 3  ;;  %s357_s24 = sshll.u32 %s536_s10, 7 }
  0x13   : > { %s737_s21 = scalar_select %p616_p11, 1, 0 }
  0x14   : > { %s627_s27 = scalar_lea.hbm %s731_s0, %s357_s24  ;;  %s107_s28 = scalar_lea.vmem [#allocation2], %s349_s23 }
  0x15   : > { %s117_s29 = sshll.u32 %s107_s28, 4  ;;  %p633_p0 = pnand %p374_p13, %p599_p4  ;;  %s629_s29 = int_to_ptr.vmem [resolvable:$true] %s117_s29 }
  0x16   : > { %s104_s2 = scalar_lea.sflag [#allocation3], %s103_s22  ;;  %s428_s3 = scalar_lea.hbm %s627_s27, 128 }
  0x17   : > { %p429_p3 = scmp.ne.s32.totalorder %s627_s27, %s428_s3  ;;  %p430_p5 = pneg %p633_p0 }
  0x18   : > { %s433_s12 = scalar_lea.hbm %s731_s0, 256  ;;  %p434_p4 = scmp.lt.u32.totalorder %s627_s27, %s731_s0 }
  0x19   : > { %p431_p6 = pnand %p430_p5, %p429_p3  ;;  %p435_p10 = scmp.lt.u32.totalorder %s433_s12, %s428_s3 }
  0x1a   : > { %p437_p12 = scmp.lt.u32.totalorder %s428_s3, %s627_s27 }
  0x1b   : > { %p432_p7 = pneg %p431_p6  ;;  %p436_p13 = por %p435_p10, %p434_p4 }
  0x1d   : > { %p438_p1 = por %p437_p12, %p436_p13 }
  0x1f   : > { %p439_p2 = pnand %p438_p1, %p432_p7 }
  0x21   : > { %442 = shalt.err (!%p439_p2)
}
  0x22   : > { %s443_s16 = scalar_lea.vmem %s629_s29, 128  ;;  %s542_s17 = smov [#allocation2]  }
  0x23   : > { %p444_p3 = scmp.ne.s32.totalorder %s629_s29, %s443_s16  ;;  %s448_s22 = sshll.u32 %s542_s17, 4  ;;  %s449_s22 = int_to_ptr.vmem [resolvable:$false] %s448_s22 }
  0x24   : > { %s450_s23 = scalar_lea.vmem %s449_s22, 256  ;;  %p451_p9 = scmp.lt.s32.totalorder %s629_s29, %s449_s22 }
  0x25   : > { %p446_p6 = pnand %p444_p3, %p430_p5  ;;  %p452_p4 = scmp.lt.s32.totalorder %s450_s23, %s443_s16 }
  0x27   : > { %p447_p11 = pneg %p446_p6  ;;  %p453_p10 = por %p452_p4, %p451_p9 }
  0x29   : > { %p454_p12 = pnand %p453_p10, %p447_p11 }
  0x2b   : > { %457 = shalt.err (!%p454_p12)
}
  0x2c   : > { %369 = dma.hbm_to_vmem [thread:$0]  (!%p633_p0), %s627_s27, 128, %s629_s29, %s104_s2  }
  0x2d   : > { %p739_p1 = scmp.lt.s32.totalorder %s540_s11, 3  ;;  %p740_p2 = scmp.ge.s32.totalorder %s540_s11, 1 }
  0x2f   : > { %p123_p5 = pnand %p740_p2, %p739_p1 }
  0x30   : > { %s669_s24 = sand.u32 (!%p123_p5), 1, %s524_s7  }
  0x31   : > { %126 = sbr.rel (%p123_p5) target bundleno = 529 (0x211), region = 24  ;;  %s353_s25 = sshll.u32 (!%p123_p5), %s669_s24, 3 }
  0x32   : > { %s129_s26 = scalar_lea.sflag (!%p123_p5), [#allocation3], %s669_s24  ;;  %s132_s28 = scalar_lea.vmem (!%p123_p5), [#allocation2], %s353_s25 }
  0x38   : > { %511 = dma.done.wait (%p605_p8), %s129_s26, 128  }
  0x39   : > { %513 = vsyncadd (%p605_p8), %s129_s26, 4294967168  ;;  %v150_v0 = vld [vmem:[%s132_s28] sm:$0xff]  ;;  %s543_s27 = smov 1   ;;  %s544_s29 = smov 16   ;;  %vm187_vm0 = vcmask 7168   ;;  %vm155_vm1 = vcmask 130048   ;;  %v191_v13 = vlaneseq }
  0x3a   : > { %184 = vrot.lane.b32.xlu0 %v150_v0, %s543_s27  ;;  %s545_s30 = smov 127   ;;  %s546_s18 = smov 112   ;;  %vm227_vm3 = vcmask 1039360   ;;  %vm234_vm5 = vcmask 1035264   ;;  %vm170_vm6 = vcmask 1043456   ;;  %vm166_vm7 = vcmask 916480  }
  0x3b   : > { %v192_v14 = vand.u32 127, %v191_v13  ;;  %vm172_vm8 = vcmask 912384   ;;  %s354_s2 = sshll.u32 %s532_s9, 4  ;;  %s149_s4 = scalar_lea.vmem [#allocation5], %s669_s24 }
  0x3c   : > { %s267_s5 = sshll.u32 %s149_s4, 4  ;;  %s682_s16 = scalar_lea.hbm %s732_s1, %s354_s2  ;;  %s684_s5 = int_to_ptr.vmem [resolvable:$true] %s267_s5 }
  0x3d   : > { %v193_v15 = vadd.s32 128, %v192_v14  ;;  %v198_v17 = vand.u32 15, %v192_v14  ;;  %vm247_vm9 = vcmp.eq.s32.totalorder %v192_v14, 1  ;;  %vm246_vm10 = vcmp.eq.s32.totalorder %v192_v14, 0  ;;  %s254_s9 = scalar_lea.sflag [#allocation4], %s669_s24  ;;  %s458_s17 = scalar_lea.vmem %s684_s5, 16 }
  0x3e   : > { %152 = vrot.lane.b32.xlu0 %v150_v0, %s544_s29  ;;  %p459_p8 = scmp.ne.s32.totalorder %s684_s5, %s458_s17  ;;  %p741_p9 = scmp.ne.s32.totalorder %s736_s19, 0 }
  0x3f   : > { %v205_v16 = vand.u32 15, %v193_v15  ;;  %vm218_vm4 = vcmp.ne.s32.totalorder %v198_v17, 15  ;;  %s547_s22 = smov [#allocation5]  }
  0x40   : > { %p460_p11 = pnand %p459_p8, %p741_p9  ;;  %s462_s23 = sshll.u32 %s547_s22, 4  ;;  %s463_s23 = int_to_ptr.vmem [resolvable:$false] %s462_s23 }
  0x41   : > { %vm219_vm2 = vcmp.ne.s32.totalorder %v205_v16, 15  ;;  %s464_s25 = scalar_lea.vmem %s463_s23, 32  ;;  %p465_p7 = scmp.lt.s32.totalorder %s684_s5, %s463_s23 }
  0x42   : > { %p461_p0 = pneg %p460_p11  ;;  %p466_p13 = scmp.lt.s32.totalorder %s464_s25, %s458_s17 }
  0x44   : > { %p467_p3 = por %p466_p13, %p465_p7 }
  0x46   : > { %p468_p6 = pnand %p467_p3, %p461_p0 }
  0xac   : > { %v185_v1 = vpop.permute.xlu0 %184 }
  0xad   : > { %v186_v2 = vrot.slane %v185_v1, 4 }
  0xaf   : > { %v188_v3 = vsel %vm187_vm0, %v186_v2, %v185_v1 }
  0xb0   : > { %v153_v4 = vpop.permute.xlu0 %152  ;;  %v190_v5 = vsub.f32 %v150_v0, %v188_v3 }
  0xb1   : > { %v154_v6 = vrot.slane %v153_v4, 4 }
  0xb2   : > { %v220_v7 = vmul.f32 %v190_v5, %v190_v5 }
  0xb3   : > { %v156_v8 = vsel %vm155_vm1, %v154_v6, %v153_v4 }
  0xb4   : > { %v158_v9 = vsub.f32 %v150_v0, %v156_v8  ;;  %223 = vrot.lane.b32.xlu1 %v220_v7, %s545_s30  ;;  %v222_v11 = vcombine.high %v220_v7, %v220_v7 }
  0xb6   : > { %v159_v10 = vmul.f32 %v158_v9, %v158_v9 }
  0xb8   : > { %225 = vrot.lane.b32.xlu1 %v222_v11, %s545_s30  ;;  %162 = vrot.lane.b32.xlu0 %v159_v10, %s546_s18  ;;  %v161_v12 = vcombine.high %v159_v10, %v159_v10 }
  0xbc   : > { %164 = vrot.lane.b32.xlu1 %v161_v12, %s546_s18 }
 0x126   : > { %v224_v18 = vpop.permute.xlu1 %223 }
 0x12a   : > { %v226_v19 = vpop.permute.xlu1 %225  ;;  %v163_v25 = vpop.permute.xlu0 %162 }
 0x12b   : > { %v228_v20 = vsel %vm227_vm3, %v224_v18, %v226_v19  ;;  %v232_v21 = vsel %vm219_vm2, %v226_v19, 0.0 }
 0x12c   : > { %v231_v22 = vsel %vm218_vm4, %v228_v20, 0.0  ;;  %v235_v23 = vsel %vm234_vm5, %v232_v21, 0.0 }
 0x12d   : > { %v233_v24 = vsel %vm170_vm6, %v231_v22, 0.0 }
 0x12e   : > { %v165_v26 = vpop.permute.xlu1 %164  ;;  %v236_v27 = vadd.f32 %v235_v23, %v233_v24 }
 0x12f   : > { %v167_v28 = vsel %vm166_vm7, %v163_v25, %v165_v26  ;;  %v173_v29 = vsel %vm172_vm8, %v165_v26, 0.0 }
 0x130   : > { %237 = vadd.xlane.f32.xlu1 %v236_v27  ;;  %v171_v30 = vsel %vm170_vm6, %v167_v28, 0.0 }
 0x131   : > { %v174_v31 = vadd.f32 %v173_v29, %v171_v30 }
 0x133   : > { %175 = vadd.xlane.f32.xlu0 %v174_v31 }
 0x1bd   : > { %v238_v32 = vpop.xlane.xlu1 %237 }
 0x1be   : > { %v239_v33 = vrot.slane %v238_v32, 4 }
 0x1c0   : > { %v240_v34 = vadd.f32 %v239_v33, %v238_v32  ;;  %v176_v35 = vpop.xlane.xlu0 %175 }
 0x1c1   : > { %v177_v36 = vrot.slane %v176_v35, 4 }
 0x1c2   : > { %v241_v37 = vrot.slane %v240_v34, 2 }
 0x1c3   : > { %v178_v38 = vadd.f32 %v177_v36, %v176_v35 }
 0x1c4   : > { %v242_v39 = vadd.f32 %v241_v37, %v240_v34 }
 0x1c5   : > { %v179_v40 = vrot.slane %v178_v38, 2 }
 0x1c6   : > { %v243_v42 = vrot.slane %v242_v39, 1 }
 0x1c7   : > { %v180_v41 = vadd.f32 %v179_v40, %v178_v38 }
 0x1c8   : > { %v244_v45 = vadd.f32 %v243_v42, %v242_v39 }
 0x1c9   : > { %v181_v43 = vrot.slane %v180_v41, 1 }
 0x1cb   : > { %v182_v44 = vadd.f32 %v181_v43, %v180_v41 }
 0x1cd   : > { %358 = vpush %v182_v44 }
 0x1ce   : > { %360 = vpush %v244_v45 }
 0x1fe   : > { %s359_s3 = spop %358 }
 0x1ff   : > { %v250_v46 = vstv %s359_s3  ;;  %s361_s12 = spop %360 }
 0x200   : > { %v248_v47 = vstv %s361_s12 }
 0x201   : > { %v249_v48 = vsel %vm247_vm9, %v248_v47, 0.0 }
 0x202   : > { %v251_v49 = vsel %vm246_vm10, %v250_v46, %v249_v48 }
 0x203   : > { %252 = vst [vmem:[%s149_s4] sm:$0x1] %v251_v49 }
 0x204   : > { %471 = shalt.err (!%p468_p6)
}
 0x205   : > { %s472_s24 = scalar_lea.hbm %s682_s16, 16  ;;  %s476_s27 = scalar_lea.hbm %s732_s1, 32 }
 0x206   : > { %p473_p4 = scmp.ne.s32.totalorder %s682_s16, %s472_s24  ;;  %p477_p1 = scmp.lt.u32.totalorder %s682_s16, %s732_s1 }
 0x207   : > { %p478_p2 = scmp.lt.u32.totalorder %s476_s27, %s472_s24  ;;  %p480_p8 = scmp.lt.u32.totalorder %s472_s24, %s682_s16 }
 0x208   : > { %p474_p10 = pnand %p473_p4, %p741_p9 }
 0x209   : > { %p479_p5 = por %p478_p2, %p477_p1 }
 0x20a   : > { %p475_p12 = pneg %p474_p10 }
 0x20b   : > { %p481_p11 = por %p480_p8, %p479_p5 }
 0x20d   : > { %p482_p0 = pnand %p481_p11, %p475_p12 }
 0x20f   : > { %485 = shalt.err (!%p482_p0)
}
 0x210   : > { %364 = dma.vmem_to_hbm [thread:$0]  (%p741_p9), %s684_s5, 16, %s682_s16, %s254_s9  }
 0x211 PF: > { %s279_s18 = sand.u32 1, %s520_s6   ;;  %p742_p7 = scmp.ne.s32.totalorder %s737_s21, 0 }
 0x212   : > { %p743_p13 = scmp.ge.s32.totalorder %s540_s11, 2  ;;  %s280_s2 = scalar_lea.sflag [#allocation4], %s279_s18 }
 0x214   : > { %p371_p3 = pnand %p743_p13, %p742_p7 }
 0x216   : > { %515 = dma.done.wait (!%p371_p3), %s280_s2, 16  }
 0x217   : > { %517 = vsyncadd (!%p371_p3), %s280_s2, 4294967280  ;;  %s17_s11 = sadd.s32 1, %s540_s11   ;;  %s744_s6 = smov %s524_s7 }
 0x218   : > { %p14_p6 = scmp.ge.s32.totalorder %s17_s11, 4   ;;  %s745_s7 = smov %s528_s8 }
 0x219   : > { %s746_s8 = smov %s614_s20  ;;  %s747_s9 = smov %s536_s10 }
 0x21a   : > { %s748_s10 = smov %s750_s14  ;;  %16 = sbr.rel (!%p14_p6) target bundleno = 6 (0x6), region = 69 }
 0x221   :  { %284 = vsyncpa [#allocation3], 1 }
 0x222   :  { %286 = vsyncpa [#allocation3 + $0x1], 1 }
 0x223   :  { %287 = vsyncpa [#allocation4], 1 }
 0x224   :  { %289 = vsyncpa [#allocation4 + $0x1], 1 }

</bundles_post_ra>
